<compile_context>
chip_gen: v6e
topology: v6e:2x2x1
jax: 0.10.0
libtpu: 0.0.40
codegen_flags: <defaults>
</compile_context>

<pallas_src>
import jax
import jax.numpy as jnp
from jax.experimental import pallas as pl
from jax.experimental.pallas import tpu as pltpu


def _round_up(a, b):
    return -(-a // b) * b


def _maxpool2x2_kernel(x_ref, o_ref):
    # x_ref block: (1, TC, 2, 2, THo, Wo)   o_ref block: (1, TC, THo, Wo)
    # The two size-2 window axes are leading axes (cheap integer indexing);
    # each slice below is a (TC, THo, Wo) tile already in the output's native
    # (sublane=THo, lane=Wo) layout, so this is pure VPU work: four loads,
    # three elementwise maxes, one store.  No cross-lane/sublane reductions.
    x00 = x_ref[0, :, 0, 0]   # window row 0, col 0
    x01 = x_ref[0, :, 0, 1]   # window row 0, col 1
    x10 = x_ref[0, :, 1, 0]   # window row 1, col 0
    x11 = x_ref[0, :, 1, 1]   # window row 1, col 1
    # NaN note: jnp.maximum propagates NaN (matches torch for finite inputs).
    o_ref[0] = jnp.maximum(jnp.maximum(x00, x01), jnp.maximum(x10, x11))


def pool2d_forward(x_nchw, *, block_budget_bytes=12 << 20):
    """MaxPool2d(kernel_size=2, stride=2); input and output in NCHW (PyTorch)."""
    N, C, H, W = x_nchw.shape
    Ho, Wo = H // 2, W // 2          # PyTorch floor behaviour (padding=0)
    assert Ho > 0 and Wo > 0, "MaxPool2d(2,2) needs H >= 2 and W >= 2"

    # ---- glue (plain JAX, outside the kernel) -------------------------------
    # Crop the odd remainder, split H/W into (out, window) pairs (free reshape
    # of the row-major NCHW buffer) and move the two size-2 window axes ahead
    # of the spatial block: (n,c,ho,2,wo,2) -> (n,c,2,2,ho,wo).  This is the
    # only relayout outside the kernel; the kernel writes NCHW directly.
    x = x_nchw[:, :, : 2 * Ho, : 2 * Wo]
    x = x.reshape(N, C, Ho, 2, Wo, 2)
    x = jnp.transpose(x, (0, 1, 3, 5, 2, 4))          # (N, C, 2, 2, Ho, Wo)

    # ---- tiling --------------------------------------------------------------
    itemsize = jnp.dtype(x.dtype).itemsize
    sub = {4: 8, 2: 16, 1: 32}.get(itemsize, 8)       # dtype sublane tile
    wo_pad = _round_up(Wo, 128)                       # lane padding in VMEM

    def padded_block_bytes(tc, tho):
        # VMEM footprint of ONE grid step: (2,2,THo,Wo) input tile + (THo,Wo)
        # output tile per channel, with trailing-dim (sublane, lane) padding.
        tho_pad = _round_up(tho, sub)
        return (4 + 1) * tc * tho_pad * wo_pad * itemsize

    # Prefer full C (one contiguous THo*Wo HBM run per (c, window-position))
    # and as many output rows as fit; shrink the Ho tile in sublane-tile steps
    # first, split channels only if a single sublane tile of rows is too big.
    tc, tho = C, Ho
    while padded_block_bytes(tc, tho) > block_budget_bytes and tho > sub:
        tho = max(sub, (tho // 2) // sub * sub)
    while padded_block_bytes(tc, tho) > block_budget_bytes and tc > 1:
        tc = (tc + 1) // 2

    grid = (N, pl.cdiv(C, tc), pl.cdiv(Ho, tho))      # all axes independent

    # Explicit scoped-VMEM limit: 2x (input + output) blocks for the default
    # double buffering plus headroom for Mosaic internals.  Above v5e's 16 MiB
    # scoped default, comfortably under v7x's 64 MiB physical VMEM per TC.
    vmem_limit = int(min(40 << 20,
                         max(16 << 20, 2 * padded_block_bytes(tc, tho) + (8 << 20))))

    # Note: partial final C / Ho tiles rely on Pallas discarding out-of-bounds
    # output writes; padded garbage in the input only feeds discarded outputs.
    out = pl.pallas_call(
        _maxpool2x2_kernel,
        out_shape=jax.ShapeDtypeStruct((N, C, Ho, Wo), x.dtype),
        grid=grid,
        in_specs=[
            pl.BlockSpec((1, tc, 2, 2, tho, Wo),
                         lambda n, c, h: (n, c, 0, 0, h, 0)),
        ],
        out_specs=pl.BlockSpec((1, tc, tho, Wo),
                               lambda n, c, h: (n, c, h, 0)),
        compiler_params=pltpu.CompilerParams(
            dimension_semantics=("parallel", "parallel", "parallel"),
            allow_input_fusion=[True],      # let XLA fold the relayout into the DMA
            vmem_limit_bytes=vmem_limit,
        ),
    )(x)
    return out                               # already NCHW: (N, C, Ho, Wo)


def _ref_maxpool(x):
    """Pure-JAX reference of MaxPool2d(kernel_size=2, stride=2) on NCHW."""
    N, C, H, W = x.shape
    Ho, Wo = H // 2, W // 2
    xc = x[:, :, : 2 * Ho, : 2 * Wo]
    return jnp.max(xc.reshape(N, C, Ho, 2, Wo, 2), axis=(3, 5))


if __name__ == "__main__":
    # Pool2d has no learnable parameters (nn.MaxPool2d only).
    key = jax.random.PRNGKey(0)
    pool = jax.jit(pool2d_forward)

    # Primary small test shape (NCHW), plus an odd-spatial case and a bf16 case.
    cases = [
        jax.random.normal(key, (2, 4, 16, 16), dtype=jnp.float32),
        jax.random.normal(key, (2, 3, 15, 17), dtype=jnp.float32),
        jax.random.normal(key, (1, 8, 32, 32), dtype=jnp.bfloat16),
    ]

    for x in cases:
        y = jax.block_until_ready(pool(x))
        ref = _ref_maxpool(x)
        N, C, H, W = x.shape
        assert y.shape == (N, C, H // 2, W // 2), (y.shape, x.shape)
        assert y.dtype == x.dtype
        assert jnp.allclose(y.astype(jnp.float32), ref.astype(jnp.float32)), \
            f"mismatch vs reference max-pool for shape {x.shape} dtype {x.dtype}"

    print("KERNEL_OK")
</pallas_src>

<mosaic_0001>
module attributes {stable_mosaic.version = 11 : i64} {
  func.func @_maxpool2x2_kernel(%arg0: i32, %arg1: i32, %arg2: i32, %arg3: memref<1x4x2x2x8x8xf32, #tpu.memory_space<vmem>>, %arg4: memref<1x4x8x8xf32, #tpu.memory_space<vmem>>) attributes {dimension_semantics = [#tpu.dimension_semantics<parallel>, #tpu.dimension_semantics<parallel>, #tpu.dimension_semantics<parallel>], iteration_bounds = array<i64: 2, 1, 1>, scalar_prefetch = 0 : i64, scratch_operands = 0 : i64, tpu.core_type = #tpu.core_type<tc>, window_params = [{transform_indices = @transform_0, window_bounds = array<i64: 1, 4, 2, 2, 8, 8>}, {transform_indices = @transform_1, window_bounds = array<i64: 1, 4, 8, 8>}]} {
    %c0 = arith.constant 0 : index
    %c0_0 = arith.constant 0 : index
    %c0_1 = arith.constant 0 : index
    %c0_2 = arith.constant 0 : index
    %c0_3 = arith.constant 0 : index
    %c0_4 = arith.constant 0 : index
    %0 = vector.load %arg3[%c0, %c0_0, %c0_1, %c0_2, %c0_3, %c0_4] : memref<1x4x2x2x8x8xf32, #tpu.memory_space<vmem>>, vector<1x4x1x1x8x8xf32>
    %1 = vector.shape_cast %0 : vector<1x4x1x1x8x8xf32> to vector<4x8x8xf32>
    %c0_5 = arith.constant 0 : index
    %c0_6 = arith.constant 0 : index
    %c0_7 = arith.constant 0 : index
    %c1 = arith.constant 1 : index
    %c0_8 = arith.constant 0 : index
    %c0_9 = arith.constant 0 : index
    %2 = vector.load %arg3[%c0_5, %c0_6, %c0_7, %c1, %c0_8, %c0_9] : memref<1x4x2x2x8x8xf32, #tpu.memory_space<vmem>>, vector<1x4x1x1x8x8xf32>
    %3 = vector.shape_cast %2 : vector<1x4x1x1x8x8xf32> to vector<4x8x8xf32>
    %c0_10 = arith.constant 0 : index
    %c0_11 = arith.constant 0 : index
    %c1_12 = arith.constant 1 : index
    %c0_13 = arith.constant 0 : index
    %c0_14 = arith.constant 0 : index
    %c0_15 = arith.constant 0 : index
    %4 = vector.load %arg3[%c0_10, %c0_11, %c1_12, %c0_13, %c0_14, %c0_15] : memref<1x4x2x2x8x8xf32, #tpu.memory_space<vmem>>, vector<1x4x1x1x8x8xf32>
    %5 = vector.shape_cast %4 : vector<1x4x1x1x8x8xf32> to vector<4x8x8xf32>
    %c0_16 = arith.constant 0 : index
    %c0_17 = arith.constant 0 : index
    %c1_18 = arith.constant 1 : index
    %c1_19 = arith.constant 1 : index
    %c0_20 = arith.constant 0 : index
    %c0_21 = arith.constant 0 : index
    %6 = vector.load %arg3[%c0_16, %c0_17, %c1_18, %c1_19, %c0_20, %c0_21] : memref<1x4x2x2x8x8xf32, #tpu.memory_space<vmem>>, vector<1x4x1x1x8x8xf32>
    %7 = vector.shape_cast %6 : vector<1x4x1x1x8x8xf32> to vector<4x8x8xf32>
    %8 = arith.maximumf %1, %3 : vector<4x8x8xf32>
    %9 = arith.maximumf %5, %7 : vector<4x8x8xf32>
    %10 = arith.maximumf %8, %9 : vector<4x8x8xf32>
    %c0_22 = arith.constant 0 : index
    %c0_23 = arith.constant 0 : index
    %c0_24 = arith.constant 0 : index
    %c0_25 = arith.constant 0 : index
    %11 = vector.load %arg4[%c0_22, %c0_23, %c0_24, %c0_25] : memref<1x4x8x8xf32, #tpu.memory_space<vmem>>, vector<1x4x8x8xf32>
    %12 = vector.shape_cast %11 : vector<1x4x8x8xf32> to vector<4x8x8xf32>
    %13 = vector.shape_cast %10 : vector<4x8x8xf32> to vector<1x4x8x8xf32>
    tpu.vector_store %arg4[%c0_22, %c0_23, %c0_24, %c0_25], %13 {strides = array<i32>} : memref<1x4x8x8xf32, #tpu.memory_space<vmem>>, vector<1x4x8x8xf32>,
    return
  }
  func.func @transform_0(%arg0: i32, %arg1: i32, %arg2: i32) -> (i32, i32, i32, i32, i32, i32) {
    %c0_i32 = arith.constant 0 : i32
    %c0_i32_0 = arith.constant 0 : i32
    %c0_i32_1 = arith.constant 0 : i32
    %c0_i32_2 = arith.constant 0 : i32
    return %arg0, %arg1, %c0_i32, %c0_i32_0, %arg2, %c0_i32_1 : i32, i32, i32, i32, i32, i32
  }
  func.func @transform_1(%arg0: i32, %arg1: i32, %arg2: i32) -> (i32, i32, i32, i32) {
    %c0_i32 = arith.constant 0 : i32
    %c0_i32_0 = arith.constant 0 : i32
    return %arg0, %arg1, %arg2, %c0_i32 : i32, i32, i32, i32
  }
}

</mosaic_0001>

<bundles_post_ra>
// kernel: pool2d_forward.2
= control target key start
LH: loop header
LB: loop body
LE: loop exit
PB: predicated region body
PF: predicated region fallthrough
CT: control target
= control target key end

     0   :  { %6 = vsyncpa [#allocation3], 0  ;;  %s705_s0 = inlined_call_operand.vmem [shape: f32[2,4,8,2,8,2], index: 0, kind: input, shape index: {}]   ;;  %s706_s1 = inlined_call_operand.hbm [shape: f32[2,4,8,8], index: 1, kind: output, shape index: {}]  }
   0x1   :  { %8 = vsyncpa [#allocation3 + $0x1], 0  ;;  %s583_s6 = smov 0   ;;  %s585_s7 = smov 0  }
   0x2   :  { %s587_s8 = smov 0   ;;  %s589_s9 = smov 0  }
   0x3   :  { %s591_s10 = smov 0   ;;  %s593_s11 = smov 0  }
   0x4 LB: > { %s405_s12 = sadd.s32 4294967295, %s568_s11   ;;  %s406_s13 = sadd.s32 4294967294, %s568_s11   ;;  %s568_s11 = sphi %s593_s11, %s14_s11   ;;  %s564_s10 = sphi %s591_s10, %s713_s10   ;;  %s560_s9 = sphi %s589_s9, %s712_s9   ;;  %s556_s8 = sphi %s587_s8, %s711_s8   ;;  %s552_s7 = sphi %s585_s7, %s710_s7   ;;  %s548_s6 = sphi %s583_s6, %s709_s6  }
   0x5   : > { %s33_s14 = sadd.s32 1, %s564_s10  ;;  %s74_s15 = sadd.s32 1, %s556_s8 }
   0x6   : > { %p35_p0 = scmp.ge.s32.totalorder %s33_s14, 2  ;;  %p84_p1 = scmp.ne.s32.totalorder %s556_s8, %s552_s7 }
   0x7   : > { %p85_p2 = scmp.eq.s32.totalorder %s405_s12, 1  ;;  %p90_p3 = scmp.ne.s32.totalorder %s552_s7, %s548_s6 }
   0x8   : > { %s715_s14 = smov (%p35_p0, %s33_s14), 0  ;;  %p91_p5 = scmp.eq.s32.totalorder %s406_s13, 1 }
   0x9   : > { %p623_p4 = por %p85_p2, %p84_p1  ;;  %s67_s17 = ssub.s32 %s564_s10, %s715_s14 }
   0xa   : > { %p409_p6 = scmp.ge.s32.totalorder %s568_s11, 1  ;;  %p72_p7 = scmp.eq.s32.totalorder %s67_s17, 0 }
   0xb   : > { %p630_p8 = por %p91_p5, %p90_p3  ;;  %p126_p9 = scmp.lt.s32.totalorder %s568_s11, 3 }
   0xc   : > { %s636_s19 = scalar_select %p72_p7, %s556_s8, %s74_s15  }
   0xd   : > { %p127_p10 = pnand %p409_p6, %p126_p9 }
   0xe   : > { %p155_p11 = scmp.lt.s32.totalorder (!%p127_p10), %s560_s9, 1  ;;  %s151_s20 = sand.u32 (!%p127_p10), 1, %s552_s7  }
   0xf   : > { %130 = sbr.rel (%p127_p10) target bundleno = 48 (0x30), region = 24  ;;  %s410_s22 = sshll.u32 (!%p127_p10), %s151_s20, 5 }
  0x10   : > { %s434_s27 = sshll.u32 (!%p127_p10), %s560_s9, 9  ;;  %s153_s28 = scalar_lea.vmem (!%p127_p10), [#allocation2], %s410_s22 }
  0x11   : > { %s316_s29 = sshll.u32 (!%p127_p10), %s153_s28, 4  ;;  %s652_s3 = scalar_lea.hbm (!%p127_p10), %s706_s1, %s434_s27  ;;  %s654_s29 = int_to_ptr.vmem [resolvable:$true] %s316_s29 }
  0x12   : > { %s660_s4 = scalar_lea.sflag (!%p127_p10), [#allocation3], %s151_s20  ;;  %s492_s5 = scalar_lea.vmem (!%p127_p10), %s654_s29, 512 }
  0x13   : > { %p493_p12 = scmp.ne.s32.totalorder (!%p127_p10), %s654_s29, %s492_s5 }
  0x14   : > { %s156_s21 = scalar_select %p155_p11, %s560_s9, 1  ;;  %vm294_vm0 = vcmask 64512  }
  0x15   : > { %p494_p13 = pnand %p493_p12, %p623_p4  ;;  %s570_s9 = smov [#allocation2]  }
  0x16   : > { %s433_s23 = sshll.u32 %s156_s21, 7  ;;  %s496_s12 = sshll.u32 %s570_s9, 4  ;;  %s497_s12 = int_to_ptr.vmem [resolvable:$false] %s496_s12 }
  0x17   : > { %s166_s26 = scalar_lea.vmem %s705_s0, %s433_s23  ;;  %p495_p0 = pneg %p494_p13 }
  0x18   : > { %v169_v0 = vld [vmem:[%s166_s26] sm:$0xff]  ;;  %v413_v1 = vld [vmem:[%s166_s26 + $0x8] sm:$0xff]  ;;  %v414_v2 = vld [vmem:[%s166_s26 + $0x10] sm:$0xff]  ;;  %s498_s13 = scalar_lea.vmem %s497_s12, 1024  ;;  %p499_p1 = scmp.lt.s32.totalorder %s654_s29, %s497_s12 }
  0x19   : > { %v415_v3 = vld [vmem:[%s166_s26 + $0x18] sm:$0xff]  ;;  %v416_v4 = vld [vmem:[%s166_s26 + $0x20] sm:$0xff]  ;;  %v417_v5 = vld [vmem:[%s166_s26 + $0x28] sm:$0xff]  ;;  %v282_v6 = vmax.f32 %v169_v0, %v413_v1  ;;  %p500_p2 = scmp.lt.s32.totalorder %s498_s13, %s492_s5 }
  0x1a   : > { %v418_v7 = vld [vmem:[%s166_s26 + $0x30] sm:$0xff]  ;;  %v419_v8 = vld [vmem:[%s166_s26 + $0x38] sm:$0xff]  ;;  %v420_v9 = vld [vmem:[%s166_s26 + $0x40] sm:$0xff]  ;;  %v283_v10 = vmax.f32 %v416_v4, %v417_v5  ;;  %v286_v11 = vmax.f32 %v414_v2, %v415_v3 }
  0x1b   : > { %v421_v12 = vld [vmem:[%s166_s26 + $0x48] sm:$0xff]  ;;  %v422_v13 = vld [vmem:[%s166_s26 + $0x50] sm:$0xff]  ;;  %v423_v14 = vld [vmem:[%s166_s26 + $0x58] sm:$0xff]  ;;  %v287_v15 = vmax.f32 %v418_v7, %v419_v8  ;;  %p501_p3 = por %p500_p2, %p499_p1 }
  0x1c   : > { %v424_v16 = vld [vmem:[%s166_s26 + $0x60] sm:$0xff]  ;;  %v425_v17 = vld [vmem:[%s166_s26 + $0x68] sm:$0xff]  ;;  %v426_v18 = vld [vmem:[%s166_s26 + $0x70] sm:$0xff]  ;;  %v284_v19 = vmax.f32 %v420_v9, %v421_v12  ;;  %v288_v20 = vmax.f32 %v422_v13, %v423_v14  ;;  %v290_v21 = vmax.f32 %v282_v6, %v286_v11 }
  0x1d   : > { %v427_v22 = vld [vmem:[%s166_s26 + $0x78] sm:$0xff]  ;;  %v285_v23 = vmax.f32 %v424_v16, %v425_v17  ;;  %v291_v24 = vmax.f32 %v283_v10, %v287_v15  ;;  %p502_p5 = pnand %p501_p3, %p495_p0 }
  0x1e   : > { %v289_v25 = vmax.f32 %v426_v18, %v427_v22  ;;  %v292_v26 = vmax.f32 %v284_v19, %v288_v20  ;;  %295 = vst.msk [vmem:[%s153_s28] sm:$0xff] %vm294_vm0, %v290_v21 }
  0x1f   : > { %296 = vst.msk [vmem:[%s153_s28 + $0x8] sm:$0xff] %vm294_vm0, %v291_v24 }
  0x20   : > { %v293_v27 = vmax.f32 %v285_v23, %v289_v25  ;;  %297 = vst.msk [vmem:[%s153_s28 + $0x10] sm:$0xff] %vm294_vm0, %v292_v26 }
  0x22   : > { %298 = vst.msk [vmem:[%s153_s28 + $0x18] sm:$0xff] %vm294_vm0, %v293_v27 }
  0x23   : > { %505 = shalt.err (!%p502_p5)
}
  0x24   : > { %s506_s15 = scalar_lea.hbm %s652_s3, 512  ;;  %s510_s21 = scalar_lea.hbm %s706_s1, 1024 }
  0x25   : > { %p507_p6 = scmp.ne.s32.totalorder %s652_s3, %s506_s15  ;;  %p511_p10 = scmp.lt.s32.totalorder %s652_s3, %s706_s1 }
  0x26   : > { %p512_p11 = scmp.lt.s32.totalorder %s510_s21, %s506_s15 }
  0x27   : > { %p508_p7 = pnand %p507_p6, %p623_p4 }
  0x28   : > { %p513_p12 = por %p512_p11, %p511_p10 }
  0x29   : > { %p509_p9 = pneg %p508_p7 }
  0x2b   : > { %p514_p13 = pnand %p513_p12, %p509_p9 }
  0x2d   : > { %517 = shalt.err (!%p514_p13)
}
  0x2e   : > { %s571_s24 = smov 128   ;;  %s572_s25 = smov 8  }
  0x2f   : > { %435 = dma.vmem_to_hbm [thread:$0]  (%p623_p4), %s654_s29, 512, %s652_s3, %s660_s4, %s571_s24, %s571_s24, %s572_s25  }
  0x30 PF: > { %p441_p0 = scmp.ge.s32.totalorder %s568_s11, 2  ;;  %s331_s26 = sand.u32 1, %s548_s6  }
  0x31   : > { %s332_s27 = scalar_lea.sflag [#allocation3], %s331_s26 }
  0x32   : > { %p438_p1 = pnand %p441_p0, %p630_p8 }
  0x34   : > { %p439_p2 = pneg %p438_p1 }
  0x36   : > { %543 = dma.done.wait (%p439_p2), %s332_s27, 512  }
  0x37   : > { %545 = vsyncadd (%p439_p2), %s332_s27, 4294966784  ;;  %s14_s11 = sadd.s32 1, %s568_s11   ;;  %s709_s6 = smov %s552_s7 }
  0x38   : > { %p11_p3 = scmp.ge.s32.totalorder %s14_s11, 4   ;;  %s710_s7 = smov %s556_s8 }
  0x39   : > { %s711_s8 = smov %s636_s19  ;;  %s712_s9 = smov %s564_s10 }
  0x3a   : > { %s713_s10 = smov %s715_s14  ;;  %13 = sbr.rel (!%p11_p3) target bundleno = 4 (0x4), region = 92 }
  0x3f   :  { %337 = vsyncpa [#allocation3], 1 }
  0x40   :  { %339 = vsyncpa [#allocation3 + $0x1], 1 }

</bundles_post_ra>
